<compile_context>
chip_gen: v6e
topology: v6e:2x2x1
jax: 0.10.0
libtpu: 0.0.40
codegen_flags: <defaults>
</compile_context>

<pallas_src>
import functools

import jax
import jax.numpy as jnp
from jax.experimental import pallas as pl
from jax.experimental.pallas import tpu as pltpu

CBAM_DROPOUT = 0.25  # unused at inference

_LANE = 128
_BF16_SUBLANE = 16   # bf16 packs 16 rows per vreg


def _round_up(n, m):
    return ((n + m - 1) // m) * m


def _cdiv(a, b):
    return (a + b - 1) // b


def _vmem_capacity_bytes():
    try:
        return int(pltpu.get_tpu_info().vmem_capacity_bytes)
    except Exception:
        return 64 << 20  # conservative fallback (v7x per-TC VMEM)


def _cbam_tail(y, w1_ref, b1_ref, w2_ref, b2_ref, scal_ref, c_real):
    """ChannelGate (3*MLP, 1x1 pools collapse) + SpatialGate (center tap + folded BN)."""
    h = jnp.dot(y.astype(jnp.bfloat16), w1_ref[...],
                preferred_element_type=jnp.float32) + b1_ref[...]
    h = jnp.maximum(h, 0.0)
    att = jnp.dot(h.astype(jnp.bfloat16), w2_ref[...],
                  preferred_element_type=jnp.float32) + b2_ref[...]
    y1 = y * jax.nn.sigmoid(3.0 * att)           # padded channel columns stay exactly 0

    # ChannelPool over the real channels: max needs a mask (-inf), mean does not
    # (padded y1 columns are exactly 0, so a plain sum is exact).
    lane = jax.lax.broadcasted_iota(jnp.int32, (1, y1.shape[-1]), 1)
    valid = lane < c_real                          # (1, Cp), broadcast against (TB, Cp)
    mx = jnp.max(jnp.where(valid, y1, -jnp.inf), axis=1, keepdims=True)
    mn = jnp.sum(y1, axis=1, keepdims=True) * (1.0 / c_real)

    conv = scal_ref[0] * mx + scal_ref[1] * mn     # 7x7 conv center taps
    sp = jax.nn.sigmoid(conv * scal_ref[2] + scal_ref[3])   # folded eval BatchNorm
    return y1 * sp


def _kernel_resident(scal_ref,        # SMEM f32[4]
                     x_ref,           # (TB, INp)  streamed (input dtype)
                     wl_ref, bl_ref,  # (INp, Cp) bf16, (1, Cp) f32    resident
                     w1_ref, b1_ref,  # (Cp, Hdp) bf16, (1, Hdp) f32   resident
                     w2_ref, b2_ref,  # (Hdp, Cp) bf16, (1, Cp) f32    resident
                     o_ref,           # (TB, Cp)   streamed
                     *, c_real):
    xb = x_ref[...].astype(jnp.bfloat16)           # in-kernel cast, hidden under MXU work
    y = jnp.dot(xb, wl_ref[...], preferred_element_type=jnp.float32) + bl_ref[...]
    o_ref[...] = _cbam_tail(y, w1_ref, b1_ref, w2_ref, b2_ref, scal_ref, c_real
                            ).astype(o_ref.dtype)


def _kernel_kstream(scal_ref,
                    x_ref,            # (TB, TK)   streamed
                    wl_ref,           # (TK, Cp)   streamed over K
                    bl_ref, w1_ref, b1_ref, w2_ref, b2_ref,   # resident
                    o_ref,            # (TB, Cp)
                    acc_ref,          # (TB, Cp) f32 VMEM scratch
                    *, c_real):
    k = pl.program_id(1)

    @pl.when(k == 0)
    def _():
        acc_ref[...] = jnp.zeros_like(acc_ref)

    acc_ref[...] += jnp.dot(x_ref[...].astype(jnp.bfloat16), wl_ref[...],
                            preferred_element_type=jnp.float32)

    @pl.when(k == pl.num_programs(1) - 1)
    def _():
        y = acc_ref[...] + bl_ref[...]
        o_ref[...] = _cbam_tail(y, w1_ref, b1_ref, w2_ref, b2_ref, scal_ref, c_real
                                ).astype(o_ref.dtype)


def prepare_params(params):
    """Zero-pad params to lane-dense shapes and cast matmul weights to bf16 (done once)."""
    IN, C = params["w_lin"].shape
    Hd = params["w1"].shape[1]
    INp, Cp, Hdp = _round_up(IN, _LANE), _round_up(C, _LANE), _round_up(Hd, _LANE)

    def pad2(a, rows, cols):
        return jnp.pad(a, ((0, rows - a.shape[0]), (0, cols - a.shape[1])))

    padded = {
        "w_lin": pad2(params["w_lin"], INp, Cp).astype(jnp.bfloat16),
        "b_lin": pad2(params["b_lin"], 1, Cp).astype(jnp.float32),
        "w1": pad2(params["w1"], Cp, Hdp).astype(jnp.bfloat16),
        "b1": pad2(params["b1"], 1, Hdp).astype(jnp.float32),
        "w2": pad2(params["w2"], Hdp, Cp).astype(jnp.bfloat16),
        "b2": pad2(params["b2"], 1, Cp).astype(jnp.float32),
        "scal": params["scal"].astype(jnp.float32),
    }
    return padded, (IN, C, Hd)


def linear_cbam(x, padded_params, logical_dims, *, out_dtype=jnp.float32,
                force_k_stream=False, k_tile=512):
    IN, C, _ = logical_dims
    B = x.shape[0]
    p = padded_params
    INp, Cp = p["w_lin"].shape
    Hdp = p["w1"].shape[1]
    out_isz = jnp.dtype(out_dtype).itemsize
    x_isz = jnp.dtype(x.dtype).itemsize

    vmem_cap = _vmem_capacity_bytes()
    budget = (vmem_cap * 3) // 4                  # ~96 MiB on v5e/v6e, ~48 MiB on v7x

    # Resident footprints (counted twice: the pipeline may allocate 2 buffers even for
    # constant index maps).
    weight_bytes_resident = 2 * ((INp * Cp + Cp * Hdp + Hdp * Cp) * 2 + (2 * Cp + Hdp) * 4)
    mlp_weight_bytes = 2 * ((Cp * Hdp + Hdp * Cp) * 2 + (2 * Cp + Hdp) * 4)

    def step_bytes(tb, kin, wl_streamed):
        # double-buffered streamed tiles
        s = 2 * (tb * kin * x_isz + tb * Cp * out_isz)
        if wl_streamed:
            s += 2 * kin * Cp * 2                 # streamed w_lin tile (bf16)
            s += tb * Cp * 4                      # f32 accumulator scratch
        # compiler-internal f32 intermediates of the tail + bf16 cast copies
        s += tb * (6 * Cp + 2 * Hdp) * 4 + tb * (kin + Cp + Hdp) * 2
        return s

    use_k_stream = force_k_stream or (
        weight_bytes_resident + step_bytes(_BF16_SUBLANE, INp, False) > budget)

    if use_k_stream:
        nk = max(1, _cdiv(INp, k_tile))
        tk = _round_up(_cdiv(INp, nk), _LANE)
        KINp = nk * tk
        wl = p["w_lin"]
        if KINp != INp:
            wl = jnp.pad(wl, ((0, KINp - INp), (0, 0)))
        kin = tk
        resident_bytes = mlp_weight_bytes
    else:
        nk, tk, KINp, wl, kin = 1, INp, INp, p["w_lin"], INp
        resident_bytes = weight_bytes_resident

    def fits(tb):
        return resident_bytes + step_bytes(tb, kin, use_k_stream) <= budget

    # --- batch tile selection: multiple of 16, minimal last-tile padding, >=2 tiles when
    #     possible (v7x megacore), shrink until the VMEM budget fits. ---
    tb_cap = 1024
    ntiles = _cdiv(B, tb_cap)
    if B >= 2 * _BF16_SUBLANE:
        ntiles = max(ntiles, 2)
    TB = _round_up(_cdiv(B, ntiles), _BF16_SUBLANE)
    max_tiles = _cdiv(B, _BF16_SUBLANE)
    while not fits(TB) and ntiles < max_tiles:
        ntiles += 1
        TB = _round_up(_cdiv(B, ntiles), _BF16_SUBLANE)
    ntiles = _cdiv(B, TB)
    Bp = ntiles * TB

    # Pad x (batch + feature); keep its dtype — the bf16 cast happens inside the kernel.
    if Bp != B or KINp != x.shape[1]:
        xp = jnp.pad(x, ((0, Bp - B), (0, KINp - x.shape[1])))
    else:
        xp = x

    need = resident_bytes + step_bytes(TB, kin, use_k_stream)
    vmem_limit = int(min(vmem_cap - (4 << 20), max(32 << 20, need + (16 << 20))))

    flops = 2 * Bp * KINp * Cp + 4 * Bp * Cp * Hdp + 10 * Bp * Cp
    bytes_accessed = (xp.size * x_isz + resident_bytes // 2
                      + (KINp * Cp * 2 if use_k_stream else 0) + Bp * Cp * out_isz)

    if use_k_stream:
        kernel = functools.partial(_kernel_kstream, c_real=C)
        grid = (ntiles, nk)
        in_specs = [
            pl.BlockSpec(memory_space=pltpu.MemorySpace.SMEM),
            pl.BlockSpec((TB, tk), lambda i, k: (i, k)),
            pl.BlockSpec((tk, Cp), lambda i, k: (k, 0)),
            pl.BlockSpec((1, Cp), lambda i, k: (0, 0)),
            pl.BlockSpec((Cp, Hdp), lambda i, k: (0, 0)),
            pl.BlockSpec((1, Hdp), lambda i, k: (0, 0)),
            pl.BlockSpec((Hdp, Cp), lambda i, k: (0, 0)),
            pl.BlockSpec((1, Cp), lambda i, k: (0, 0)),
        ]
        out_specs = pl.BlockSpec((TB, Cp), lambda i, k: (i, 0))
        scratch_shapes = [pltpu.VMEM((TB, Cp), jnp.float32)]
        dim_sem = ("parallel", "arbitrary")
    else:
        def resident(shape):
            return pl.BlockSpec(shape, lambda i: (0,) * len(shape))

        kernel = functools.partial(_kernel_resident, c_real=C)
        grid = (ntiles,)
        in_specs = [
            pl.BlockSpec(memory_space=pltpu.MemorySpace.SMEM),
            pl.BlockSpec((TB, INp), lambda i: (i, 0)),
            resident((INp, Cp)), resident((1, Cp)),
            resident((Cp, Hdp)), resident((1, Hdp)),
            resident((Hdp, Cp)), resident((1, Cp)),
        ]
        out_specs = pl.BlockSpec((TB, Cp), lambda i: (i, 0))
        scratch_shapes = []
        dim_sem = ("parallel",)

    out = pl.pallas_call(
        kernel,
        out_shape=jax.ShapeDtypeStruct((Bp, Cp), out_dtype),
        grid=grid,
        in_specs=in_specs,
        out_specs=out_specs,
        scratch_shapes=scratch_shapes,
        compiler_params=pltpu.CompilerParams(
            dimension_semantics=dim_sem,
            vmem_limit_bytes=vmem_limit,
        ),
        cost_estimate=pl.CostEstimate(
            flops=int(flops),
            transcendentals=int(Bp * Cp + Bp),
            bytes_accessed=int(bytes_accessed),
        ),
    )(p["scal"], xp, wl, p["b_lin"], p["w1"], p["b1"], p["w2"], p["b2"])

    return out[:B, :C]


def linear_cbam_ref(x, p):
    """Pure-JAX f32 reference of the same (eval-mode) forward pass."""
    y = x @ p["w_lin"] + p["b_lin"]
    h = jnp.maximum(y @ p["w1"] + p["b1"], 0.0)
    att = 3.0 * (h @ p["w2"] + p["b2"])
    y1 = y * jax.nn.sigmoid(att)
    mx = jnp.max(y1, axis=1, keepdims=True)
    mn = jnp.mean(y1, axis=1, keepdims=True)
    conv = p["scal"][0] * mx + p["scal"][1] * mn
    sp = jax.nn.sigmoid(conv * p["scal"][2] + p["scal"][3])
    return y1 * sp


def make_params(in_features, out_features, key):
    C = out_features
    Hd = max(C // 16, 1)
    ks = jax.random.split(key, 7)
    w_lin = 0.1 * jax.random.normal(ks[0], (in_features, C), jnp.float32)
    b_lin = 0.1 * jax.random.normal(ks[1], (1, C), jnp.float32)
    w1 = 0.1 * jax.random.normal(ks[2], (C, Hd), jnp.float32)
    b1 = 0.1 * jax.random.normal(ks[3], (1, Hd), jnp.float32)
    w2 = 0.1 * jax.random.normal(ks[4], (Hd, C), jnp.float32)
    b2 = 0.1 * jax.random.normal(ks[5], (1, C), jnp.float32)
    # SpatialGate conv: Conv2d(2, 1, kernel_size=7, padding=3, bias=False)
    conv_w = 0.1 * jax.random.normal(ks[6], (1, 2, 7, 7), jnp.float32)
    # BatchNorm2d(1) in eval mode with freshly-initialized running stats
    bn_gamma, bn_beta = jnp.float32(1.0), jnp.float32(0.0)
    bn_mean, bn_var, eps = jnp.float32(0.0), jnp.float32(1.0), 1e-5
    bn_scale = bn_gamma / jnp.sqrt(bn_var + eps)
    bn_shift = bn_beta - bn_mean * bn_scale
    # Only the center tap of the 7x7 kernel touches the zero-padded 1x1 spatial input.
    scal = jnp.array([conv_w[0, 0, 3, 3], conv_w[0, 1, 3, 3], bn_scale, bn_shift],
                     dtype=jnp.float32)
    return {"w_lin": w_lin, "b_lin": b_lin, "w1": w1, "b1": b1,
            "w2": w2, "b2": b2, "scal": scal}


if __name__ == "__main__":
    key = jax.random.PRNGKey(0)

    # --- Test 1: small shapes, resident-weight path ---
    B, IN_FEATURES, OUT_FEATURES = 2, 32, 64
    kx, kp, key = jax.random.split(key, 3)
    x = jax.random.normal(kx, (B, IN_FEATURES), jnp.float32)
    params = make_params(IN_FEATURES, OUT_FEATURES, kp)
    padded_params, dims = prepare_params(params)
    out = jax.block_until_ready(linear_cbam(x, padded_params, dims))
    ref = jax.block_until_ready(linear_cbam_ref(x, params))
    assert out.shape == (B, OUT_FEATURES), out.shape
    assert jnp.allclose(out, ref, rtol=2e-2, atol=2e-2), float(jnp.max(jnp.abs(out - ref)))

    # --- Test 2: exercise the K-streaming path (large-in_features / v7x VMEM regime) ---
    B2, IN2, OUT2 = 40, 300, 72
    kx2, kp2 = jax.random.split(key)
    x2 = jax.random.normal(kx2, (B2, IN2), jnp.float32)
    params2 = make_params(IN2, OUT2, kp2)
    padded_params2, dims2 = prepare_params(params2)
    out2 = jax.block_until_ready(
        linear_cbam(x2, padded_params2, dims2, force_k_stream=True, k_tile=128))
    ref2 = jax.block_until_ready(linear_cbam_ref(x2, params2))
    assert out2.shape == (B2, OUT2), out2.shape
    assert jnp.allclose(out2, ref2, rtol=2e-2, atol=2e-2), float(jnp.max(jnp.abs(out2 - ref2)))

    print("KERNEL_OK")
</pallas_src>

<mosaic_0001>
module attributes {stable_mosaic.version = 11 : i64} {
  func.func @_kernel_resident(%arg0: i32, %arg1: memref<4xf32, #tpu.memory_space<smem>>, %arg2: memref<16x128xf32, #tpu.memory_space<vmem>>, %arg3: memref<128x128xbf16, #tpu.memory_space<vmem>>, %arg4: memref<1x128xf32, #tpu.memory_space<vmem>>, %arg5: memref<128x128xbf16, #tpu.memory_space<vmem>>, %arg6: memref<1x128xf32, #tpu.memory_space<vmem>>, %arg7: memref<128x128xbf16, #tpu.memory_space<vmem>>, %arg8: memref<1x128xf32, #tpu.memory_space<vmem>>, %arg9: memref<16x128xf32, #tpu.memory_space<vmem>>) attributes {dimension_semantics = [#tpu.dimension_semantics<parallel>], iteration_bounds = array<i64: 1>, scalar_prefetch = 0 : i64, scratch_operands = 0 : i64, tpu.core_type = #tpu.core_type<tc>, window_params = [{transform_indices = @transform_0, window_bounds = array<i64: 4>}, {transform_indices = @transform_1, window_bounds = array<i64: 16, 128>}, {pipeline_mode = #tpu.pipeline_mode<synchronous>, transform_indices = @transform_2, window_bounds = array<i64: 128, 128>}, {pipeline_mode = #tpu.pipeline_mode<synchronous>, transform_indices = @transform_3, window_bounds = array<i64: 1, 128>}, {pipeline_mode = #tpu.pipeline_mode<synchronous>, transform_indices = @transform_4, window_bounds = array<i64: 128, 128>}, {pipeline_mode = #tpu.pipeline_mode<synchronous>, transform_indices = @transform_5, window_bounds = array<i64: 1, 128>}, {pipeline_mode = #tpu.pipeline_mode<synchronous>, transform_indices = @transform_6, window_bounds = array<i64: 128, 128>}, {pipeline_mode = #tpu.pipeline_mode<synchronous>, transform_indices = @transform_7, window_bounds = array<i64: 1, 128>}, {transform_indices = @transform_8, window_bounds = array<i64: 16, 128>}]} {
    %c0 = arith.constant 0 : index
    %c0_0 = arith.constant 0 : index
    %0 = vector.load %arg2[%c0, %c0_0] : memref<16x128xf32, #tpu.memory_space<vmem>>, vector<16x128xf32>
    %1 = arith.truncf %0 : vector<16x128xf32> to vector<16x128xbf16>
    %c0_1 = arith.constant 0 : index
    %c0_2 = arith.constant 0 : index
    %2 = vector.load %arg3[%c0_1, %c0_2] : memref<128x128xbf16, #tpu.memory_space<vmem>>, vector<128x128xbf16>
    %cst = arith.constant dense<0.000000e+00> : vector<16x128xf32>
    %3 = tpu.matmul %1, %2, %cst {dimension_numbers = #tpu.dot_dimension_numbers<[1], [0], [0], [1], [0, 0, 1, 1], [], []>} : vector<16x128xbf16>, vector<128x128xbf16>, vector<16x128xf32> -> vector<16x128xf32>
    %c0_3 = arith.constant 0 : index
    %c0_4 = arith.constant 0 : index
    %4 = vector.load %arg4[%c0_3, %c0_4] : memref<1x128xf32, #tpu.memory_space<vmem>>, vector<1x128xf32>
    %5 = vector.broadcast %4 : vector<1x128xf32> to vector<16x128xf32>
    %6 = arith.addf %3, %5 : vector<16x128xf32>
    %7 = arith.truncf %6 : vector<16x128xf32> to vector<16x128xbf16>
    %c0_5 = arith.constant 0 : index
    %c0_6 = arith.constant 0 : index
    %8 = vector.load %arg5[%c0_5, %c0_6] : memref<128x128xbf16, #tpu.memory_space<vmem>>, vector<128x128xbf16>
    %cst_7 = arith.constant dense<0.000000e+00> : vector<16x128xf32>
    %9 = tpu.matmul %7, %8, %cst_7 {dimension_numbers = #tpu.dot_dimension_numbers<[1], [0], [0], [1], [0, 0, 1, 1], [], []>} : vector<16x128xbf16>, vector<128x128xbf16>, vector<16x128xf32> -> vector<16x128xf32>
    %c0_8 = arith.constant 0 : index
    %c0_9 = arith.constant 0 : index
    %10 = vector.load %arg6[%c0_8, %c0_9] : memref<1x128xf32, #tpu.memory_space<vmem>>, vector<1x128xf32>
    %11 = vector.broadcast %10 : vector<1x128xf32> to vector<16x128xf32>
    %12 = arith.addf %9, %11 : vector<16x128xf32>
    %cst_10 = arith.constant 0.000000e+00 : f32
    %13 = vector.broadcast %cst_10 : f32 to vector<16x128xf32>
    %14 = arith.maximumf %12, %13 : vector<16x128xf32>
    %15 = arith.truncf %14 : vector<16x128xf32> to vector<16x128xbf16>
    %c0_11 = arith.constant 0 : index
    %c0_12 = arith.constant 0 : index
    %16 = vector.load %arg7[%c0_11, %c0_12] : memref<128x128xbf16, #tpu.memory_space<vmem>>, vector<128x128xbf16>
    %cst_13 = arith.constant dense<0.000000e+00> : vector<16x128xf32>
    %17 = tpu.matmul %15, %16, %cst_13 {dimension_numbers = #tpu.dot_dimension_numbers<[1], [0], [0], [1], [0, 0, 1, 1], [], []>} : vector<16x128xbf16>, vector<128x128xbf16>, vector<16x128xf32> -> vector<16x128xf32>
    %c0_14 = arith.constant 0 : index
    %c0_15 = arith.constant 0 : index
    %18 = vector.load %arg8[%c0_14, %c0_15] : memref<1x128xf32, #tpu.memory_space<vmem>>, vector<1x128xf32>
    %19 = vector.broadcast %18 : vector<1x128xf32> to vector<16x128xf32>
    %20 = arith.addf %17, %19 : vector<16x128xf32>
    %cst_16 = arith.constant 3.000000e+00 : f32
    %21 = vector.broadcast %cst_16 : f32 to vector<16x128xf32>
    %22 = arith.mulf %21, %20 : vector<16x128xf32>
    %23 = arith.negf %22 : vector<16x128xf32>
    %24 = math.exp %23 : vector<16x128xf32>
    %cst_17 = arith.constant 1.000000e+00 : f32
    %25 = vector.broadcast %cst_17 : f32 to vector<16x128xf32>
    %26 = arith.addf %25, %24 : vector<16x128xf32>
    %27 = arith.divf %25, %26 : vector<16x128xf32>
    %28 = arith.mulf %6, %27 : vector<16x128xf32>
    %29 = tpu.iota {dimensions = array<i32: 1>} : vector<1x128xi32>
    %c64_i32 = arith.constant 64 : i32
    %30 = vector.broadcast %c64_i32 : i32 to vector<1x128xi32>
    %31 = arith.cmpi slt, %29, %30 : vector<1x128xi32>
    %cst_18 = arith.constant 0xFF800000 : f32
    %32 = vector.shape_cast %31 : vector<1x128xi1> to vector<1x128xi1>
    %33 = vector.broadcast %32 : vector<1x128xi1> to vector<16x128xi1>
    %34 = vector.broadcast %cst_18 : f32 to vector<16x128xf32>
    %35 = arith.select %33, %28, %34 : vector<16x128xi1>, vector<16x128xf32>
    %cst_19 = arith.constant dense<0xFF800000> : vector<16xf32>
    %36 = vector.multi_reduction <maximumf>, %35, %cst_19 [1] : vector<16x128xf32> to vector<16xf32>
    %37 = vector.shape_cast %36 : vector<16xf32> to vector<16x1xf32>
    %cst_20 = arith.constant dense<0.000000e+00> : vector<16xf32>
    %38 = vector.multi_reduction <add>, %28, %cst_20 [1] : vector<16x128xf32> to vector<16xf32>
    %39 = vector.shape_cast %38 : vector<16xf32> to vector<16x1xf32>
    %cst_21 = arith.constant 1.562500e-02 : f32
    %40 = vector.broadcast %cst_21 : f32 to vector<16x1xf32>
    %41 = arith.mulf %39, %40 : vector<16x1xf32>
    %c0_22 = arith.constant 0 : index
    %42 = memref.load %arg1[%c0_22] : memref<4xf32, #tpu.memory_space<smem>>
    %43 = vector.broadcast %42 : f32 to vector<16x1xf32>
    %44 = arith.mulf %43, %37 : vector<16x1xf32>
    %c1 = arith.constant 1 : index
    %45 = memref.load %arg1[%c1] : memref<4xf32, #tpu.memory_space<smem>>
    %46 = vector.broadcast %45 : f32 to vector<16x1xf32>
    %47 = arith.mulf %46, %41 : vector<16x1xf32>
    %48 = arith.addf %44, %47 : vector<16x1xf32>
    %c2 = arith.constant 2 : index
    %49 = memref.load %arg1[%c2] : memref<4xf32, #tpu.memory_space<smem>>
    %50 = vector.broadcast %49 : f32 to vector<16x1xf32>
    %51 = arith.mulf %48, %50 : vector<16x1xf32>
    %c3 = arith.constant 3 : index
    %52 = memref.load %arg1[%c3] : memref<4xf32, #tpu.memory_space<smem>>
    %53 = vector.broadcast %52 : f32 to vector<16x1xf32>
    %54 = arith.addf %51, %53 : vector<16x1xf32>
    %55 = arith.negf %54 : vector<16x1xf32>
    %56 = math.exp %55 : vector<16x1xf32>
    %cst_23 = arith.constant 1.000000e+00 : f32
    %57 = vector.broadcast %cst_23 : f32 to vector<16x1xf32>
    %58 = arith.addf %57, %56 : vector<16x1xf32>
    %59 = arith.divf %57, %58 : vector<16x1xf32>
    %60 = vector.broadcast %59 : vector<16x1xf32> to vector<16x128xf32>
    %61 = arith.mulf %28, %60 : vector<16x128xf32>
    %c0_24 = arith.constant 0 : index
    %c0_25 = arith.constant 0 : index
    %62 = vector.load %arg9[%c0_24, %c0_25] : memref<16x128xf32, #tpu.memory_space<vmem>>, vector<16x128xf32>
    tpu.vector_store %arg9[%c0_24, %c0_25], %61 {strides = array<i32>} : memref<16x128xf32, #tpu.memory_space<vmem>>, vector<16x128xf32>,
    return
  }
  func.func @transform_0(%arg0: i32) -> i32 {
    %c0_i32 = arith.constant 0 : i32
    %c0_i32_0 = arith.constant 0 : i32
    return %c0_i32 : i32
  }
  func.func @transform_1(%arg0: i32) -> (i32, i32) {
    %c0_i32 = arith.constant 0 : i32
    %c0_i32_0 = arith.constant 0 : i32
    return %arg0, %c0_i32 : i32, i32
  }
  func.func @transform_2(%arg0: i32) -> (i32, i32) {
    %c0_i32 = arith.constant 0 : i32
    %c0_i32_0 = arith.constant 0 : i32
    %c0_i32_1 = arith.constant 0 : i32
    return %c0_i32, %c0_i32_0 : i32, i32
  }
  func.func @transform_3(%arg0: i32) -> (i32, i32) {
    %c0_i32 = arith.constant 0 : i32
    %c0_i32_0 = arith.constant 0 : i32
    %c0_i32_1 = arith.constant 0 : i32
    return %c0_i32, %c0_i32_0 : i32, i32
  }
  func.func @transform_4(%arg0: i32) -> (i32, i32) {
    %c0_i32 = arith.constant 0 : i32
    %c0_i32_0 = arith.constant 0 : i32
    %c0_i32_1 = arith.constant 0 : i32
    return %c0_i32, %c0_i32_0 : i32, i32
  }
  func.func @transform_5(%arg0: i32) -> (i32, i32) {
    %c0_i32 = arith.constant 0 : i32
    %c0_i32_0 = arith.constant 0 : i32
    %c0_i32_1 = arith.constant 0 : i32
    return %c0_i32, %c0_i32_0 : i32, i32
  }
  func.func @transform_6(%arg0: i32) -> (i32, i32) {
    %c0_i32 = arith.constant 0 : i32
    %c0_i32_0 = arith.constant 0 : i32
    %c0_i32_1 = arith.constant 0 : i32
    return %c0_i32, %c0_i32_0 : i32, i32
  }
  func.func @transform_7(%arg0: i32) -> (i32, i32) {
    %c0_i32 = arith.constant 0 : i32
    %c0_i32_0 = arith.constant 0 : i32
    %c0_i32_1 = arith.constant 0 : i32
    return %c0_i32, %c0_i32_0 : i32, i32
  }
  func.func @transform_8(%arg0: i32) -> (i32, i32) {
    %c0_i32 = arith.constant 0 : i32
    %c0_i32_0 = arith.constant 0 : i32
    return %arg0, %c0_i32 : i32, i32
  }
}

</mosaic_0001>

<bundles_post_ra>
// kernel: tpu_custom_call.1
= control target key start
LH: loop header
LB: loop body
LE: loop exit
PB: predicated region body
PF: predicated region fallthrough
CT: control target
= control target key end

     0   :  { %13 = vsyncpa [#allocation5], 0  ;;  %s947_s0 = inlined_call_operand.hbm [shape: f32[4], index: 0, kind: input, shape index: {}]   ;;  %s948_s1 = inlined_call_operand.hbm [shape: f32[16,128], index: 1, kind: input, shape index: {}]   ;;  %s949_s2 = inlined_call_operand.hbm [shape: bf16[128,128], index: 2, kind: input, shape index: {}]   ;;  %s950_s3 = inlined_call_operand.vmem [shape: f32[1,128], index: 3, kind: input, shape index: {}]   ;;  %s951_s4 = inlined_call_operand.hbm [shape: bf16[128,128], index: 4, kind: input, shape index: {}]   ;;  %s952_s5 = inlined_call_operand.vmem [shape: f32[1,128], index: 5, kind: input, shape index: {}]   ;;  %s953_s6 = inlined_call_operand.hbm [shape: bf16[128,128], index: 6, kind: input, shape index: {}]   ;;  %s954_s7 = inlined_call_operand.vmem [shape: f32[1,128], index: 7, kind: input, shape index: {}]   ;;  %s955_s8 = inlined_call_operand.hbm [shape: f32[16,128], index: 8, kind: output, shape index: {}]  }
   0x1   :  { %14 = vsyncpa [#allocation3], 0 }
   0x2   :  { %15 = vsyncpa [#allocation8], 0 }
   0x3   :  { %16 = vsyncpa [#allocation11], 0 }
   0x4   :  { %17 = vsyncpa [#allocation4], 0  ;;  %s818_s27 = smov [#allocation7]  }
   0x5   :  { %s43_s28 = sshll.u32 %s818_s27, 4  ;;  %s44_s28 = int_to_ptr.vmem [resolvable:$true] %s43_s28 }
   0x6   :  { %s708_s29 = scalar_lea.vmem %s44_s28, 1024  ;;  %p713_p1 = scmp.lt.s32.totalorder %s44_s28, %s44_s28 }
   0x7   :  { %p709_p0 = scmp.ne.s32.totalorder %s44_s28, %s708_s29  ;;  %p714_p2 = scmp.lt.s32.totalorder %s708_s29, %s708_s29 }
   0x9   :  { %p715_p3 = por %p714_p2, %p713_p1 }
   0xb   :  { %p716_p4 = pnand %p715_p3, %p709_p0 }
   0xd   :  { %719 = shalt.err (!%p716_p4)
}
   0xe   :  { %s819_s30 = smov 64   ;;  %s820_s9 = smov 4  }
   0xf   :  { %49 = dma.hbm_to_vmem [thread:$0]  %s949_s2, 1024, %s44_s28, [#allocation8], %s819_s30, %s819_s30, %s820_s9  }
  0x10   :  { %s821_s12 = smov [#allocation2]   ;;  %s822_s15 = smov [#allocation6]  }
  0x11   :  { %25 = dma.hbm_to_smem %s947_s0, 16, %s821_s12, [#allocation5]  }
  0x12   :  { %s31_s16 = sshll.u32 %s822_s15, 4  ;;  %s32_s16 = int_to_ptr.vmem [resolvable:$true] %s31_s16 }
  0x13   :  { %s736_s17 = scalar_lea.vmem %s32_s16, 256  ;;  %p741_p6 = scmp.lt.s32.totalorder %s32_s16, %s32_s16 }
  0x14   :  { %p737_p5 = scmp.ne.s32.totalorder %s32_s16, %s736_s17  ;;  %p742_p7 = scmp.lt.s32.totalorder %s736_s17, %s736_s17 }
  0x16   :  { %p743_p8 = por %p742_p7, %p741_p6 }
  0x18   :  { %p744_p9 = pnand %p743_p8, %p737_p5 }
  0x1a   :  { %747 = shalt.err (!%p744_p9)
}
  0x1b   :  { %s823_s18 = smov 128   ;;  %s824_s19 = smov 8  }
  0x1c   :  { %37 = dma.hbm_to_vmem [thread:$0]  %s948_s1, 256, %s32_s16, [#allocation3], %s823_s18, %s823_s18, %s824_s19  }
  0x1d   :  { %s825_s0 = smov [#allocation9]   ;;  %s826_s22 = smov [#allocation10]  }
  0x1e   :  { %s57_s21 = sshll.u32 %s825_s0, 4  ;;  %s71_s23 = sshll.u32 %s826_s22, 4  ;;  %s58_s21 = int_to_ptr.vmem [resolvable:$true] %s57_s21  ;;  %s72_s23 = int_to_ptr.vmem [resolvable:$true] %s71_s23 }
  0x1f   :  { %s756_s24 = scalar_lea.vmem %s58_s21, 1024  ;;  %p761_p11 = scmp.lt.s32.totalorder %s58_s21, %s58_s21 }
  0x20   :  { %p757_p10 = scmp.ne.s32.totalorder %s58_s21, %s756_s24  ;;  %p762_p12 = scmp.lt.s32.totalorder %s756_s24, %s756_s24 }
  0x22   :  { %p763_p13 = por %p762_p12, %p761_p11 }
  0x24   :  { %p764_p0 = pnand %p763_p13, %p757_p10 }
  0x26   :  { %767 = shalt.err (!%p764_p0)
}
  0x27   :  { %63 = dma.hbm_to_vmem [thread:$0]  %s951_s4, 1024, %s58_s21, [#allocation8], %s819_s30, %s819_s30, %s820_s9  }
  0x28   :  { %s776_s1 = scalar_lea.vmem %s72_s23, 1024  ;;  %p781_p2 = scmp.lt.s32.totalorder %s72_s23, %s72_s23 }
  0x29   :  { %p777_p1 = scmp.ne.s32.totalorder %s72_s23, %s776_s1  ;;  %p782_p3 = scmp.lt.s32.totalorder %s776_s1, %s776_s1 }
  0x2b   :  { %p783_p4 = por %p782_p3, %p781_p2 }
  0x2d   :  { %p784_p5 = pnand %p783_p4, %p777_p1 }
  0x2f   :  { %787 = shalt.err (!%p784_p5)
}
  0x30   :  { %77 = dma.hbm_to_vmem [thread:$0]  %s953_s6, 1024, %s72_s23, [#allocation11], %s819_s30, %s819_s30, %s820_s9  }
  0x31   :  { %808 = dma.done.wait [#allocation5], 16  }
  0x32   :  { %809 = vsyncadd [#allocation5], 4294967280 }
  0x33   :  { %810 = dma.done.wait [#allocation3], 256  }
  0x34   :  { %811 = vsyncadd [#allocation3], 4294967040 }
  0x35   :  { %812 = dma.done.wait [#allocation8], 2048  }
  0x36   :  { %813 = vsyncadd [#allocation8], 4294965248 }
  0x37   :  { %814 = dma.done.wait [#allocation11], 1024  }
  0x38   :  { %815 = vsyncadd [#allocation11], 4294966272 }
  0x39   :  { %95 = sfence }
  0x3a   :  { %v660_v0 = vld [vmem:[#allocation7 + $0x38] sm:$0xff]   ;;  %v827_v1 = vmov 0.0   ;;  %v661_v2 = vld [vmem:[#allocation7 + $0x30] sm:$0xff]   ;;  %vm828_vm0 = vmmov 0   ;;  %v662_v3 = vld [vmem:[#allocation7 + $0x28] sm:$0xff]   ;;  %v456_v61 = vlaneseq  ;;  %s557_s10 = sld [smem:[#allocation2 + $0x2]] }
  0x3b   :  { %588 = vmatprep.subr.bf16.mxu0 %v827_v1  ;;  %608 = vmatprep.subr.bf16.mxu1 %v827_v1  ;;  %v668_v4 = vld [vmem:[#allocation9 + $0x38] sm:$0xff]   ;;  %v663_v5 = vld [vmem:[#allocation7 + $0x20] sm:$0xff]   ;;  %v669_v6 = vld [vmem:[#allocation9 + $0x30] sm:$0xff]   ;;  %s558_s11 = sld [smem:[#allocation2 + $0x3]]  ;;  %s829_s12 = smov [#allocation12]  }
  0x3c   :  { %589 = vmatpush3.bf16.msra.mxu0 %v660_v0  ;;  %604 = vmatprep.mubr.msk.bf16.mxu0 %vm828_vm0, %v827_v1  ;;  %v664_v7 = vld [vmem:[#allocation7 + $0x18] sm:$0xff]   ;;  %v670_v8 = vld [vmem:[#allocation9 + $0x28] sm:$0xff]   ;;  %v665_v9 = vld [vmem:[#allocation7 + $0x10] sm:$0xff]   ;;  %v457_v62 = vand.u32 127, %v456_v61  ;;  %s512_s13 = sshll.u32 %s829_s12, 4  ;;  %s513_s13 = int_to_ptr.vmem [resolvable:$true] %s512_s13 }
  0x3d   :  { %590 = vmatprep.subr.bf16.mxu0 %v827_v1  ;;  %624 = vmatprep.mubr.msk.bf16.mxu1 %vm828_vm0, %v827_v1  ;;  %v671_v10 = vld [vmem:[#allocation9 + $0x20] sm:$0xff]   ;;  %v666_v11 = vld [vmem:[#allocation7 + $0x8] sm:$0xff]   ;;  %v672_v12 = vld [vmem:[#allocation9 + $0x18] sm:$0xff]   ;;  %s788_s14 = scalar_lea.vmem %s513_s13, 256  ;;  %p793_p7 = scmp.lt.s32.totalorder %s513_s13, %s513_s13 }
  0x3e   :  { %609 = vmatpush3.bf16.msra.mxu1 %v668_v4  ;;  %v667_v13 = vld [vmem:[#allocation7] sm:$0xff]   ;;  %v97_v14 = vld [vmem:[#allocation6] sm:$0xff]  ;;  %v98_v15 = vld [vmem:[#allocation6 + $0x8] sm:$0xff]  ;;  %vm458_vm1 = vcmp.lt.s32.totalorder %v457_v62, 64  ;;  %p789_p6 = scmp.ne.s32.totalorder %s513_s13, %s788_s14  ;;  %p794_p8 = scmp.lt.s32.totalorder %s788_s14, %s788_s14 }
  0x3f   :  { %610 = vmatprep.subr.bf16.mxu1 %v827_v1  ;;  %v673_v16 = vld [vmem:[#allocation9 + $0x10] sm:$0xff]   ;;  %v99_v17 = vpack.c.bf16 %v98_v15, %v97_v14  ;;  %v674_v18 = vld [vmem:[#allocation9 + $0x8] sm:$0xff]   ;;  %v675_v19 = vld [vmem:[#allocation9] sm:$0xff]  }
  0x40   :  { %591 = vmatpush3.bf16.msra.mxu0 %v661_v2  ;;  %v676_v20 = vld [vmem:[#allocation10 + $0x38] sm:$0xff]   ;;  %v677_v21 = vld [vmem:[#allocation10 + $0x30] sm:$0xff]   ;;  %v678_v22 = vld [vmem:[#allocation10 + $0x28] sm:$0xff]   ;;  %p795_p9 = por %p794_p8, %p793_p7 }
  0x41   :  { %592 = vmatprep.subr.bf16.mxu0 %v827_v1  ;;  %v679_v23 = vld [vmem:[#allocation10 + $0x20] sm:$0xff]   ;;  %v680_v24 = vld [vmem:[#allocation10 + $0x18] sm:$0xff]   ;;  %v527_v26 = vld [vmem:[%s950_s3] ss:$0 sm:$0xff] }
  0x42   :  { %611 = vmatpush3.bf16.msra.mxu1 %v669_v6  ;;  %v681_v33 = vld [vmem:[#allocation10 + $0x10] sm:$0xff]   ;;  %v682_v34 = vld [vmem:[#allocation10 + $0x8] sm:$0xff]   ;;  %v683_v35 = vld [vmem:[#allocation10] sm:$0xff]   ;;  %p796_p10 = pnand %p795_p9, %p789_p6 }
  0x43   :  { %612 = vmatprep.subr.bf16.mxu1 %v827_v1  ;;  %v536_v36 = vld [vmem:[%s952_s5] ss:$0 sm:$0xff]  ;;  %s473_s5 = sld [smem:[#allocation2]] }
  0x44   :  { %593 = vmatpush3.bf16.msra.mxu0 %v662_v3  ;;  %v545_v46 = vld [vmem:[%s954_s7] ss:$0 sm:$0xff]  ;;  %s556_s7 = sld [smem:[#allocation2 + $0x1]] }
  0x45   :  { %594 = vmatprep.subr.bf16.mxu0 %v827_v1 }
  0x46   :  { %613 = vmatpush3.bf16.msra.mxu1 %v670_v8 }
  0x47   :  { %614 = vmatprep.subr.bf16.mxu1 %v827_v1 }
  0x48   :  { %595 = vmatpush3.bf16.msra.mxu0 %v663_v5 }
  0x49   :  { %596 = vmatprep.subr.bf16.mxu0 %v827_v1  ;;  %v474_v5 = vstv %s473_s5 }
  0x4a   :  { %615 = vmatpush3.bf16.msra.mxu1 %v671_v10  ;;  %v478_v6 = vstv %s556_s7 }
  0x4b   :  { %616 = vmatprep.subr.bf16.mxu1 %v827_v1 }
  0x4c   :  { %597 = vmatpush3.bf16.msra.mxu0 %v664_v7 }
  0x4d   :  { %598 = vmatprep.subr.bf16.mxu0 %v827_v1 }
  0x4e   :  { %617 = vmatpush3.bf16.msra.mxu1 %v672_v12  ;;  %v484_v12 = vstv %s557_s10 }
  0x4f   :  { %618 = vmatprep.subr.bf16.mxu1 %v827_v1 }
  0x50   :  { %599 = vmatpush3.bf16.msra.mxu0 %v665_v9 }
  0x51   :  { %600 = vmatprep.subr.bf16.mxu0 %v827_v1 }
  0x52   :  { %619 = vmatpush3.bf16.msra.mxu1 %v673_v16 }
  0x53   :  { %620 = vmatprep.subr.bf16.mxu1 %v827_v1 }
  0x54   :  { %601 = vmatpush3.bf16.msra.mxu0 %v666_v11 }
  0x55   :  { %602 = vmatprep.subr.bf16.mxu0 %v827_v1 }
  0x56   :  { %621 = vmatpush3.bf16.msra.mxu1 %v674_v18 }
  0x57   :  { %622 = vmatprep.subr.bf16.mxu1 %v827_v1 }
  0x58   :  { %603 = vmatpush3.bf16.msra.mxu0 %v667_v13 }
  0x59   :  { %628 = vmatprep.subr.bf16.mxu0 %v827_v1 }
  0x5a   :  { %623 = vmatpush3.bf16.msra.mxu1 %v675_v19 }
  0x5b   :  { %605 = vmatmul.mubr.bf16.vlgmr.msra.gmra.mxu0 %v99_v17  ;;  %v488_v17 = vstv %s558_s11 }
  0x5c   :  { %644 = vmatprep.mubr.msk.bf16.mxu0 %vm828_vm0, %v827_v1  ;;  %629 = vmatpush3.bf16.msra.mxu0 %v676_v20 }
  0x5d   :  { %630 = vmatprep.subr.bf16.mxu0 %v827_v1 }
  0x60   :  { %631 = vmatpush3.bf16.msra.mxu0 %v677_v21 }
  0x61   :  { %632 = vmatprep.subr.bf16.mxu0 %v827_v1 }
  0x64   :  { %633 = vmatpush3.bf16.msra.mxu0 %v678_v22 }
  0x65   :  { %634 = vmatprep.subr.bf16.mxu0 %v827_v1 }
  0x68   :  { %635 = vmatpush3.bf16.msra.mxu0 %v679_v23 }
  0x69   :  { %636 = vmatprep.subr.bf16.mxu0 %v827_v1 }
  0x6c   :  { %637 = vmatpush3.bf16.msra.mxu0 %v680_v24 }
  0x6d   :  { %638 = vmatprep.subr.bf16.mxu0 %v827_v1 }
  0x70   :  { %639 = vmatpush3.bf16.msra.mxu0 %v681_v33 }
  0x71   :  { %640 = vmatprep.subr.bf16.mxu0 %v827_v1 }
  0x74   :  { %641 = vmatpush3.bf16.msra.mxu0 %v682_v34 }
  0x75   :  { %642 = vmatprep.subr.bf16.mxu0 %v827_v1 }
  0x78   :  { %643 = vmatpush3.bf16.msra.mxu0 %v683_v35 }
 0x11b   :  { %v205_v25 = vpop.f32.mrf.mxu0 }
 0x11c   :  { %v206_v29 = vadd.f32 %v527_v26, %v205_v25 }
 0x11d   :  { %v606_v27 = vpop.f32.mrf.mxu0 }
 0x11f   :  { %v208_v28 = vpop.f32.mrf.mxu0 }
 0x120   :  { %v209_v30 = vadd.f32 %v527_v26, %v208_v28 }
 0x121   :  { %v607_v31 = vpop.f32.mrf.mxu0 }
 0x122   :  { %v212_v32 = vpack.c.bf16 %v209_v30, %v206_v29 }
 0x124   :  { %625 = vmatmul.mubr.bf16.vlgmr.msra.gmra.mxu1 %v212_v32 }
 0x1e4   :  { %v318_v37 = vpop.f32.mrf.mxu1 }
 0x1e5   :  { %v319_v39 = vadd.f32 %v536_v36, %v318_v37 }
 0x1e6   :  { %v626_v38 = vpop.f32.mrf.mxu1 }
 0x1e7   :  { %v325_v43 = vmax.f32 %v319_v39, 0.0 }
 0x1e8   :  { %v321_v40 = vpop.f32.mrf.mxu1 }
 0x1e9   :  { %v322_v41 = vadd.f32 %v536_v36, %v321_v40 }
 0x1ea   :  { %v627_v42 = vpop.f32.mrf.mxu1 }
 0x1eb   :  { %v326_v44 = vmax.f32 %v322_v41, 0.0 }
 0x1ed   :  { %v327_v45 = vpack.c.bf16 %v326_v44, %v325_v43 }
 0x1ef   :  { %645 = vmatmul.mubr.bf16.vlgmr.msra.gmra.mxu0 %v327_v45 }
 0x2af   :  { %v433_v47 = vpop.f32.mrf.mxu0 }
 0x2b0   :  { %v434_v48 = vadd.f32 %v545_v46, %v433_v47 }
 0x2b1   :  { %v646_v49 = vpop.f32.mrf.mxu0 }
 0x2b2   :  { %v554_v50 = vmul.f32 -3.0, %v434_v48 }
 0x2b3   :  { %v436_v51 = vpop.f32.mrf.mxu0 }
 0x2b4   :  { %v444_v52 = vmul.f32 1.442695, %v554_v50  ;;  %v437_v53 = vadd.f32 %v545_v46, %v436_v51 }
 0x2b5   :  { %v647_v54 = vpop.f32.mrf.mxu0 }
 0x2b6   :  { %684 = vpow2.f32 %v444_v52  ;;  %v555_v55 = vmul.f32 -3.0, %v437_v53 }
 0x2b8   :  { %v446_v56 = vmul.f32 1.442695, %v555_v55 }
 0x2ba   :  { %686 = vpow2.f32 %v446_v56 }
 0x2c3   :  { %v685_v57 = vpop.eup %684 }
 0x2c4   :  { %v448_v58 = vadd.f32 1.0, %v685_v57 }
 0x2c6   :  { %688 = vrcp.f32 %v448_v58 }
 0x2c7   :  { %v687_v59 = vpop.eup %686 }
 0x2c8   :  { %v449_v60 = vadd.f32 1.0, %v687_v59 }
 0x2ca   :  { %690 = vrcp.f32 %v449_v60 }
 0x2d3   :  { %v689_v63 = vpop.eup %688 }
 0x2d4   :  { %v454_v0 = vmul.f32 %v689_v63, %v206_v29 }
 0x2d6   :  { %467 = vadd.xlane.f32.xlu0 %v454_v0  ;;  %v461_v1 = vsel %vm458_vm1, %v454_v0, -inf }
 0x2d7   :  { %v691_v2 = vpop.eup %690  ;;  %463 = vmax.xlane.f32.xlu1 %v461_v1 }
 0x2d8   :  { %v455_v3 = vmul.f32 %v691_v2, %v209_v30 }
 0x2da   :  { %469 = vadd.xlane.f32.xlu0 %v455_v3  ;;  %v462_v4 = vsel %vm458_vm1, %v455_v3, -inf }
 0x2db   :  { %465 = vmax.xlane.f32.xlu1 %v462_v4 }
 0x35f   :  { %v468_v7 = vpop.xlane.xlu0 %467 }
 0x360   :  { %v471_v8 = vmul.f32 0.015625, %v468_v7  ;;  %v464_v9 = vpop.xlane.xlu1 %463 }
 0x361   :  { %v475_v10 = vmul.f32 %v474_v5, %v464_v9 }
 0x362   :  { %v479_v11 = vmul.f32 %v478_v6, %v471_v8 }
 0x363   :  { %v470_v13 = vpop.xlane.xlu0 %469 }
 0x364   :  { %v481_v14 = vadd.f32 %v479_v11, %v475_v10  ;;  %v472_v15 = vmul.f32 0.015625, %v470_v13  ;;  %v466_v16 = vpop.xlane.xlu1 %465 }
 0x365   :  { %v476_v18 = vmul.f32 %v474_v5, %v466_v16 }
 0x366   :  { %v485_v19 = vmul.f32 %v484_v12, %v481_v14  ;;  %v480_v20 = vmul.f32 %v478_v6, %v472_v15 }
 0x368   :  { %v489_v21 = vadd.f32 %v488_v17, %v485_v19  ;;  %v482_v22 = vadd.f32 %v480_v20, %v476_v18 }
 0x36a   :  { %v559_v23 = vmul.f32 -1.442695, %v489_v21  ;;  %v486_v24 = vmul.f32 %v484_v12, %v482_v22 }
 0x36c   :  { %692 = vpow2.f32 %v559_v23  ;;  %v490_v25 = vadd.f32 %v488_v17, %v486_v24 }
 0x36e   :  { %v560_v26 = vmul.f32 -1.442695, %v490_v25 }
 0x370   :  { %694 = vpow2.f32 %v560_v26 }
 0x379   :  { %v693_v27 = vpop.eup %692 }
 0x37a   :  { %v497_v28 = vadd.f32 1.0, %v693_v27 }
 0x37c   :  { %696 = vrcp.f32 %v497_v28 }
 0x37d   :  { %v695_v29 = vpop.eup %694 }
 0x37e   :  { %v498_v30 = vadd.f32 1.0, %v695_v29 }
 0x380   :  { %698 = vrcp.f32 %v498_v30 }
 0x389   :  { %v697_v31 = vpop.eup %696 }
 0x38a   :  { %v503_v32 = vmul.f32 %v697_v31, %v454_v0 }
 0x38c   :  { %505 = vst [vmem:[#allocation12] sm:$0xff] %v503_v32 }
 0x38d   :  { %v699_v33 = vpop.eup %698 }
 0x38e   :  { %v504_v34 = vmul.f32 %v699_v33, %v455_v3 }
 0x390   :  { %506 = vst [vmem:[#allocation12 + $0x8] sm:$0xff] %v504_v34 }
 0x391   :  { %799 = shalt.err (!%p796_p10)
}
 0x392   :  { %518 = dma.vmem_to_hbm [thread:$0]  %s513_s13, 256, %s955_s8, [#allocation4], %s823_s18, %s823_s18, %s824_s19  }
 0x393   :  { %816 = dma.done.wait [#allocation4], 256  }
 0x394   :  { %817 = vsyncadd [#allocation4], 4294967040 }
 0x395   :  { %522 = vsyncpa [#allocation3], 1 }
 0x396   :  { %523 = vsyncpa [#allocation8], 1 }
 0x397   :  { %524 = vsyncpa [#allocation11], 1 }
 0x398   :  { %525 = vsyncpa [#allocation4], 1 }
 0x399   :  { %526 = vsyncpa [#allocation5], 1 }

</bundles_post_ra>
